<compile_context>
chip_gen: v5e
topology: v5e:2x2
jax: 0.10.0
libtpu: 0.0.40
codegen_flags: <defaults>
</compile_context>

<pallas_src>
import functools

import jax
import jax.numpy as jnp
from jax.experimental import pallas as pl
from jax.experimental.pallas import tpu as pltpu

_LANE = 128
_SUBLANE = 8


def _round_up(x, m):
    return (x + m - 1) // m * m


def _logreg_kernel(x_ref, w_ref, b_ref, o_ref, acc_ref, *, tf, cw, n_features,
                   ragged):
    # x_ref:   (tb, tf)  current X tile
    # w_ref:   (1, tf)   lane-dense weight row chunk for this k step
    # b_ref:   (1, 1)    bias scalar in SMEM
    # o_ref:   (tb, 1)   output block (resident across k)
    # acc_ref: (tb, cw)  f32 partial-sum accumulator (resident across k)
    k = pl.program_id(1)

    @pl.when(k == 0)
    def _init():
        acc_ref[...] = jnp.zeros_like(acc_ref)

    if ragged:
        lane_ids = jax.lax.broadcasted_iota(jnp.int32, (1, cw), 1)

    acc = acc_ref[...]
    for c in range(tf // cw):
        sl = slice(c * cw, (c + 1) * cw)
        xc = x_ref[:, sl]                              # (tb, cw)
        if ragged:
            # Mask the ragged feature tail.  Masking the loaded x chunk keeps
            # NaN/Inf garbage in the block's padded columns out of the sum
            # (zero-padded w alone would not: NaN * 0 = NaN).
            cols = k * tf + c * cw + lane_ids          # (1, cw)
            xc = jnp.where(cols < n_features, xc, 0.0)
        acc = acc + xc * w_ref[:, sl]                  # (tb, cw) * (1, cw)
    acc_ref[...] = acc

    @pl.when(k == pl.num_programs(1) - 1)
    def _finalize():
        z = jnp.sum(acc_ref[...], axis=1, keepdims=True) + b_ref[0, 0]
        o_ref[...] = jax.nn.sigmoid(z).astype(o_ref.dtype)


def logistic_regression_forward(x, w, b, *, tb=1024, tf=2048):
    """sigmoid(x @ w + b) -- forward pass of LogisticRegression.

    x: (B, F) f32, w: (F, 1) f32 (transposed nn.Linear weight), b: (1, 1) f32.
    Returns (B, 1) f32.
    """
    B, F = x.shape
    assert w.shape == (F, 1), w.shape
    b = jnp.reshape(b, (1, 1)).astype(jnp.float32)

    # ---- Batch tile: multiple of 8 (or the full dim when B < 8).  Keep at
    # least 2 batch tiles when possible so both v7x TensorCores get work.
    if B <= _SUBLANE:
        tb = B
    else:
        tb = max(_SUBLANE, (min(tb, B) // _SUBLANE) * _SUBLANE)
        if (B + tb - 1) // tb < 2:
            tb = max(_SUBLANE, _round_up((B + 1) // 2, _SUBLANE))

    # ---- Feature tile: multiple of 128 and <= F (or the full dim when
    # F <= 128), so raggedness only appears as the tail of the last block.
    if F <= _LANE:
        tf = F
    else:
        tf = max(_LANE, (min(tf, F) // _LANE) * _LANE)

    grid = (pl.cdiv(B, tb), pl.cdiv(F, tf))
    n_k = grid[1]
    ragged = (F % tf) != 0
    cw = min(_LANE, tf)          # lane-chunk width for the VPU contraction

    # Weight as a lane-dense row, zero-padded (cheap: F floats) so every
    # (1, tf) weight block is fully in-bounds.  X itself is NOT padded.
    fp = n_k * tf
    w_row = jnp.reshape(w.astype(jnp.float32), (1, F))
    if fp != F:
        w_row = jnp.pad(w_row, ((0, 0), (0, fp - F)))

    kernel = functools.partial(_logreg_kernel, tf=tf, cw=cw, n_features=F,
                               ragged=ragged)

    # Scoped-VMEM budget: double-buffered X tile + small w/out/acc/temps,
    # capped at 48 MiB (headroom below v7x's 64 MiB physical VMEM).
    x_tile_bytes = tb * tf * 4
    vmem_limit = int(min(48 << 20, max(16 << 20, 2 * x_tile_bytes + (12 << 20))))

    out = pl.pallas_call(
        kernel,
        out_shape=jax.ShapeDtypeStruct((B, 1), jnp.float32),
        grid=grid,
        in_specs=[
            # X streamed & double-buffered tile by tile (the HBM roofline).
            pl.BlockSpec((tb, tf), lambda i, k: (i, k)),
            # Lane-dense weight row chunk: 8 KiB contiguous per k step.
            pl.BlockSpec((1, tf), lambda i, k: (0, k)),
            # Bias as a scalar in SMEM (no padded VMEM tile).
            pl.BlockSpec(memory_space=pltpu.MemorySpace.SMEM),
        ],
        # Output block index is constant over k -> VMEM-resident across the
        # reduction; written once at the last k step.
        out_specs=pl.BlockSpec((tb, 1), lambda i, k: (i, 0)),
        scratch_shapes=[pltpu.VMEM((tb, cw), jnp.float32)],
        compiler_params=pltpu.CompilerParams(
            dimension_semantics=("parallel", "arbitrary"),
            vmem_limit_bytes=vmem_limit),
        cost_estimate=pl.CostEstimate(
            flops=2 * B * F,
            transcendentals=B,
            bytes_accessed=(B * F + fp + B) * 4),
    )(x, w_row, b)

    return out


if __name__ == "__main__":
    key = jax.random.PRNGKey(0)

    # Small shapes consistent with the module: batch=8, n_input_features=32.
    batch, n_features = 8, 32
    kx, kw, kb = jax.random.split(key, 3)
    x = jax.random.normal(kx, (batch, n_features), dtype=jnp.float32)
    bound = 1.0 / (n_features ** 0.5)
    w = jax.random.uniform(kw, (n_features, 1), minval=-bound, maxval=bound,
                           dtype=jnp.float32)
    b = jax.random.uniform(kb, (1, 1), minval=-bound, maxval=bound,
                           dtype=jnp.float32)

    y = logistic_regression_forward(x, w, b)
    y = jax.block_until_ready(y)
    y_ref = jax.nn.sigmoid(x @ w + b)
    assert y.shape == (batch, 1)
    assert jnp.allclose(y, y_ref, atol=1e-5, rtol=1e-5)

    # Second case: non-divisible B/F with small tiles -> exercises the cdiv
    # grid, in-kernel feature-tail masking, and the ragged batch tail.
    B2, F2 = 300, 400
    k2x, k2w, k2b = jax.random.split(jax.random.PRNGKey(1), 3)
    x2 = jax.random.normal(k2x, (B2, F2), dtype=jnp.float32)
    bound2 = 1.0 / (F2 ** 0.5)
    w2 = jax.random.uniform(k2w, (F2, 1), minval=-bound2, maxval=bound2,
                            dtype=jnp.float32)
    b2 = jax.random.uniform(k2b, (1, 1), minval=-bound2, maxval=bound2,
                            dtype=jnp.float32)

    y2 = logistic_regression_forward(x2, w2, b2, tb=128, tf=128)
    y2 = jax.block_until_ready(y2)
    y2_ref = jax.nn.sigmoid(x2 @ w2 + b2)
    assert y2.shape == (B2, 1)
    assert jnp.allclose(y2, y2_ref, atol=1e-5, rtol=1e-5)

    print("KERNEL_OK")
</pallas_src>

<mosaic_0001>
module attributes {stable_mosaic.version = 11 : i64} {
  func.func @_logreg_kernel(%arg0: i32, %arg1: i32, %arg2: memref<8x32xf32, #tpu.memory_space<vmem>>, %arg3: memref<1x32xf32, #tpu.memory_space<vmem>>, %arg4: memref<1x1xf32, #tpu.memory_space<smem>>, %arg5: memref<8x1xf32, #tpu.memory_space<vmem>>, %arg6: memref<8x32xf32, #tpu.memory_space<vmem>>) attributes {dimension_semantics = [#tpu.dimension_semantics<parallel>, #tpu.dimension_semantics<arbitrary>], iteration_bounds = array<i64: 1, 1>, scalar_prefetch = 0 : i64, scratch_operands = 1 : i64, tpu.core_type = #tpu.core_type<tc>, window_params = [{transform_indices = @transform_0, window_bounds = array<i64: 8, 32>}, {transform_indices = @transform_1, window_bounds = array<i64: 1, 32>}, {transform_indices = @transform_2, window_bounds = array<i64: 1, 1>}, {transform_indices = @transform_3, window_bounds = array<i64: 8, 1>}]} {
    %c0_i32 = arith.constant 0 : i32
    %0 = arith.cmpi eq, %arg1, %c0_i32 : i32
    %1 = arith.extui %0 : i1 to i32
    %c0_i32_0 = arith.constant 0 : i32
    %2 = arith.cmpi ne, %1, %c0_i32_0 : i32
    scf.if %2 {
      %cst = arith.constant 0.000000e+00 : f32
      %13 = vector.broadcast %cst : f32 to vector<8x32xf32>
      %c0_10 = arith.constant 0 : index
      %c0_11 = arith.constant 0 : index
      %14 = vector.load %arg6[%c0_10, %c0_11] : memref<8x32xf32, #tpu.memory_space<vmem>>, vector<8x32xf32>
      tpu.vector_store %arg6[%c0_10, %c0_11], %13 {strides = array<i32>} : memref<8x32xf32, #tpu.memory_space<vmem>>, vector<8x32xf32>,
    } else {
    }
    %c0 = arith.constant 0 : index
    %c0_1 = arith.constant 0 : index
    %3 = vector.load %arg6[%c0, %c0_1] : memref<8x32xf32, #tpu.memory_space<vmem>>, vector<8x32xf32>
    %c0_2 = arith.constant 0 : index
    %c0_3 = arith.constant 0 : index
    %4 = vector.load %arg2[%c0_2, %c0_3] : memref<8x32xf32, #tpu.memory_space<vmem>>, vector<8x32xf32>
    %c0_4 = arith.constant 0 : index
    %c0_5 = arith.constant 0 : index
    %5 = vector.load %arg3[%c0_4, %c0_5] : memref<1x32xf32, #tpu.memory_space<vmem>>, vector<1x32xf32>
    %6 = vector.broadcast %5 : vector<1x32xf32> to vector<8x32xf32>
    %7 = arith.mulf %4, %6 : vector<8x32xf32>
    %8 = arith.addf %3, %7 : vector<8x32xf32>
    %c0_6 = arith.constant 0 : index
    %c0_7 = arith.constant 0 : index
    %9 = vector.load %arg6[%c0_6, %c0_7] : memref<8x32xf32, #tpu.memory_space<vmem>>, vector<8x32xf32>
    tpu.vector_store %arg6[%c0_6, %c0_7], %8 {strides = array<i32>} : memref<8x32xf32, #tpu.memory_space<vmem>>, vector<8x32xf32>,
    %c0_i32_8 = arith.constant 0 : i32
    %10 = arith.cmpi eq, %arg1, %c0_i32_8 : i32
    %11 = arith.extui %10 : i1 to i32
    %c0_i32_9 = arith.constant 0 : i32
    %12 = arith.cmpi ne, %11, %c0_i32_9 : i32
    scf.if %12 {
      %c0_10 = arith.constant 0 : index
      %c0_11 = arith.constant 0 : index
      %13 = vector.load %arg6[%c0_10, %c0_11] : memref<8x32xf32, #tpu.memory_space<vmem>>, vector<8x32xf32>
      %cst = arith.constant dense<0.000000e+00> : vector<8xf32>
      %14 = vector.multi_reduction <add>, %13, %cst [1] : vector<8x32xf32> to vector<8xf32>
      %15 = vector.shape_cast %14 : vector<8xf32> to vector<8x1xf32>
      %c0_12 = arith.constant 0 : index
      %c0_13 = arith.constant 0 : index
      %16 = memref.load %arg4[%c0_12, %c0_13] : memref<1x1xf32, #tpu.memory_space<smem>>
      %17 = vector.broadcast %16 : f32 to vector<8x1xf32>
      %18 = arith.addf %15, %17 : vector<8x1xf32>
      %19 = arith.negf %18 : vector<8x1xf32>
      %20 = math.exp %19 : vector<8x1xf32>
      %cst_14 = arith.constant 1.000000e+00 : f32
      %21 = vector.broadcast %cst_14 : f32 to vector<8x1xf32>
      %22 = arith.addf %21, %20 : vector<8x1xf32>
      %23 = arith.divf %21, %22 : vector<8x1xf32>
      %c0_15 = arith.constant 0 : index
      %c0_16 = arith.constant 0 : index
      %24 = vector.load %arg5[%c0_15, %c0_16] : memref<8x1xf32, #tpu.memory_space<vmem>>, vector<8x1xf32>
      tpu.vector_store %arg5[%c0_15, %c0_16], %23 {strides = array<i32>} : memref<8x1xf32, #tpu.memory_space<vmem>>, vector<8x1xf32>,
    } else {
    }
    return
  }
  func.func @transform_0(%arg0: i32, %arg1: i32) -> (i32, i32) {
    %c0_i32 = arith.constant 0 : i32
    return %arg0, %arg1 : i32, i32
  }
  func.func @transform_1(%arg0: i32, %arg1: i32) -> (i32, i32) {
    %c0_i32 = arith.constant 0 : i32
    %c0_i32_0 = arith.constant 0 : i32
    return %c0_i32, %arg1 : i32, i32
  }
  func.func @transform_2(%arg0: i32, %arg1: i32) -> (i32, i32) {
    %c0_i32 = arith.constant 0 : i32
    %c0_i32_0 = arith.constant 0 : i32
    %c0_i32_1 = arith.constant 0 : i32
    return %c0_i32, %c0_i32_0 : i32, i32
  }
  func.func @transform_3(%arg0: i32, %arg1: i32) -> (i32, i32) {
    %c0_i32 = arith.constant 0 : i32
    %c0_i32_0 = arith.constant 0 : i32
    return %arg0, %c0_i32 : i32, i32
  }
}

</mosaic_0001>

<bundles_post_ra>
// kernel: tpu_custom_call.1
= control target key start
LH: loop header
LB: loop body
LE: loop exit
PB: predicated region body
PF: predicated region fallthrough
CT: control target
= control target key end

     0   :  { %9 = vsyncpa [#allocation5], 0  ;;  %s115_s15 = smov [#allocation4]   ;;  %s149_s0 = inlined_call_operand.hbm [shape: f32[8,32], index: 0, kind: input, shape index: {}]   ;;  %s150_s1 = inlined_call_operand.vmem [shape: f32[1,32], index: 1, kind: input, shape index: {}]   ;;  %s151_s2 = inlined_call_operand.<no memory space> [shape: f32[1,1], index: 2, kind: input, shape index: {}]   ;;  %s152_s3 = inlined_call_operand.vmem [shape: f32[8,1], index: 3, kind: output, shape index: {}]  }
   0x1   :  { %s15_s14 = sshll.u32 %s149_s0, 4  ;;  %s17_s16 = sshll.u32 %s115_s15, 4  ;;  %s16_s14 = int_to_ptr.hbm [resolvable:$true] %s15_s14  ;;  %s18_s16 = int_to_ptr.vmem [resolvable:$true] %s17_s16 }
   0x2   :  { %20 = dma.hbm_to_vmem [thread:$0]  %s16_s14, 128, %s18_s16, [#allocation5]  }
   0x3   :  { %113 = dma.done.wait [#allocation5], 128  }
   0x4   :  { %114 = vsyncadd [#allocation5], 4294967168  ;;  %vm33_vm0 = vcmask 261120   ;;  %v116_v0 = vmov 0.0   ;;  %v36_v1 = vld [vmem:[#allocation4] sm:$0xff]  ;;  %v53_v8 = vstv %s151_s2  ;;  %vm74_vm4 = vcmask 7168  }
   0x5   :  { %34 = vst.msk [vmem:[#allocation2] sm:$0xff] %vm33_vm0, %v116_v0  ;;  %v84_v2 = vld [vmem:[%s150_s1] ss:$0 sm:$0xff] }
   0x6   :  { %v41_v4 = vmul.f32 %v84_v2, %v36_v1 }
   0xc   :  { %v35_v3 = vld [vmem:[#allocation2] sm:$0xff] }
   0xd   :  { %v42_v5 = vadd.f32 %v41_v4, %v35_v3 }
   0xf   :  { %44 = vst.msk [vmem:[#allocation2] sm:$0xff] %vm33_vm0, %v42_v5 }
  0x16   :  { %v48_v6 = vld [vmem:[#allocation2] sm:$0xff] }
  0x17   :  { %v49_v7 = vsel %vm33_vm0, %v48_v6, 0.0 }
  0x18   :  { %50 = vadd.xlane.f32.xlu0 %v49_v7 }
  0x8b   :  { %v51_v9 = vpop.xlane.xlu0 %50 }
  0x8c   :  { %v54_v10 = vadd.f32 %v53_v8, %v51_v9 }
  0x8e   :  { %v81_v11 = vmul.f32 -1.442695, %v54_v10 }
  0x90   :  { %85 = vpow2.f32 %v81_v11 }
  0x96   :  { %v86_v12 = vpop.eup %85 }
  0x97   :  { %v58_v13 = vadd.f32 1.0, %v86_v12 }
  0x99   :  { %87 = vrcp.f32 %v58_v13  ;;  %v70_v17 = vand.u32 2147483648, %v58_v13  ;;  %v68_v19 = vand.u32 2147483647, %v58_v13  ;;  %vm64_vm2 = vweird.f32 %v58_v13 }
  0x9b   :  { %v71_v21 = vor.u32 1.1754944e-38, %v70_v17  ;;  %vm69_vm5 = vcmp.eq.f32.partialorder %v68_v19, 8.507059e+37 }
  0x9f   :  { %v88_v14 = vpop.eup %87 }
  0xa0   :  { %v60_v15 = vmul.f32 %v88_v14, %v58_v13  ;;  %vm65_vm1 = vweird.f32 %v88_v14 }
  0xa1   :  { %vm66_vm3 = vmor %vm64_vm2, %vm65_vm1 }
  0xa2   :  { %v61_v16 = vsub.f32 1.0, %v60_v15 }
  0xa4   :  { %v62_v18 = vmul.f32 %v88_v14, %v61_v16 }
  0xa6   :  { %v63_v20 = vadd.f32 %v88_v14, %v62_v18 }
  0xa8   :  { %v67_v22 = vsel %vm66_vm3, %v88_v14, %v63_v20 }
  0xa9   :  { %v72_v23 = vsel %vm69_vm5, %v71_v21, %v67_v22 }
  0xaa   :  { %75 = vst.msk [vmem:[%s152_s3] sm:$0xff] %vm74_vm4, %v72_v23 }
  0xab   :  { %80 = vsyncpa [#allocation5], 1 }

</bundles_post_ra>
